<compile_context>
chip_gen: v7x
topology: tpu7x:2x2x1
jax: 0.10.0
libtpu: 0.0.40
codegen_flags: <defaults>
</compile_context>

<pallas_src>
import functools

import jax
import jax.numpy as jnp
from jax.experimental import pallas as pl
from jax.experimental.pallas import tpu as pltpu

LANES = 128
SUBLANES = 8


def _round_up(x, m):
    return ((x + m - 1) // m) * m


def _linear_kernel(z_ref, wt_ref, b_ref, o_ref):
    # z_ref : (tm, dim)      f32 activation tile (read straight from HBM, no wrapper cast)
    # wt_ref: (dim, n_pad)   padded transposed weight (compute dtype), resident across grid
    # b_ref : (1, n_pad)     padded f32 bias row, resident across grid
    # o_ref : (tm, n_pad)    f32 output tile (lane-dense: n_pad is a multiple of 128)
    z = z_ref[...].astype(wt_ref.dtype)        # VPU cast on in-VMEM tile: hidden under DMA
    acc = jnp.dot(z, wt_ref[...], preferred_element_type=jnp.float32)
    o_ref[...] = (acc + b_ref[...]).astype(o_ref.dtype)


def prepare_classifier_params(weight, bias, compute_dtype=jnp.bfloat16):
    """One-time param prep: transpose + zero-pad classes up to 128 lanes."""
    num_classes, dim = weight.shape
    n_pad = _round_up(num_classes, LANES)
    wt_pad = jnp.zeros((dim, n_pad), compute_dtype)
    wt_pad = wt_pad.at[:, :num_classes].set(weight.T.astype(compute_dtype))
    b_pad = jnp.zeros((1, n_pad), jnp.float32)
    b_pad = b_pad.at[:, :num_classes].set(bias.astype(jnp.float32))
    return wt_pad, b_pad


def _choose_tm(B, block_m):
    tm = min(block_m, B)
    if tm == B:
        # Whole batch fits in one tile.  Only split it in two for B >= 256, so that on v7x
        # each TensorCore gets enough work to amortize the extra grid step (no-op on
        # single-TC v5e/v6e).
        if B >= 256:
            half = _round_up((B + 1) // 2, SUBLANES)
            if half < B:
                tm = half
    else:
        tm = max(SUBLANES, (tm // SUBLANES) * SUBLANES)  # keep sublane (8) alignment
    return tm


def _vmem_estimate_bytes(tm, dim, n_pad, w_itemsize):
    # double-buffered f32 activations + f32 outputs + resident (but 2-buffered) weight/bias
    return (2 * tm * dim * 4) + (2 * tm * n_pad * 4) + (2 * dim * n_pad * w_itemsize) + (2 * n_pad * 4)


@functools.partial(jax.jit, static_argnames=("num_classes", "block_m", "return_padded"))
def _forward_padded(z, wt_pad, b_pad, *, num_classes, block_m, return_padded=False):
    B, dim = z.shape
    n_pad = wt_pad.shape[1]
    tm = _choose_tm(B, block_m)
    grid = (pl.cdiv(B, tm),)

    # Activation stream: f32 tiles, optionally 3-deep buffered for long grids so the DMA
    # issue/wait latency between tiles is hidden (kernel is purely DMA-rate limited).
    z_spec_kwargs = {}
    if grid[0] >= 4:
        z_spec_kwargs["pipeline_mode"] = pl.Buffered(3)
    z_spec = pl.BlockSpec((tm, dim), lambda i: (i, 0), **z_spec_kwargs)

    cp_kwargs = dict(dimension_semantics=("parallel",))  # batch tiles shard across v7x TCs
    est = _vmem_estimate_bytes(tm, dim, n_pad, jnp.dtype(wt_pad.dtype).itemsize)
    if est > (12 << 20):
        # Guard for larger block_m tuning: v5e's default scoped VMEM is only 16 MiB.
        cp_kwargs["vmem_limit_bytes"] = min(100 << 20, int(est * 1.25))

    out_pad = pl.pallas_call(
        _linear_kernel,
        out_shape=jax.ShapeDtypeStruct((B, n_pad), jnp.float32),
        grid_spec=pltpu.PrefetchScalarGridSpec(
            num_scalar_prefetch=0,
            grid=grid,
            in_specs=[
                z_spec,                                         # activations: tiled over batch
                pl.BlockSpec((dim, n_pad), lambda i: (0, 0)),   # weight: full, resident
                pl.BlockSpec((1, n_pad), lambda i: (0, 0)),     # bias: full, resident
            ],
            out_specs=pl.BlockSpec((tm, n_pad), lambda i: (i, 0)),
        ),
        compiler_params=pltpu.CompilerParams(**cp_kwargs),
    )(z, wt_pad, b_pad)

    if return_padded:
        # Cheapest path for downstream softmax/argmax: zero lanes are harmless there.
        return out_pad
    return out_pad[:, :num_classes]


class GoogLeNetClassifier:
    """Pallas-TPU forward for GoogLeNet_Classifier.  Param prep runs once at construction."""

    def __init__(self, weight, bias, *, compute_dtype=jnp.bfloat16, block_m=1024):
        self.num_classes, self.dim = weight.shape
        self.block_m = int(block_m)
        self.wt_pad, self.b_pad = prepare_classifier_params(weight, bias, compute_dtype)

    def __call__(self, z, *, return_padded=False):
        assert z.ndim == 2 and z.shape[1] == self.dim, "expected z of shape (B, dim)"
        return _forward_padded(
            z, self.wt_pad, self.b_pad,
            num_classes=self.num_classes, block_m=self.block_m,
            return_padded=return_padded)


def googlenet_classifier_forward(z, weight, bias, *, block_m=1024,
                                 compute_dtype=jnp.bfloat16):
    """Functional convenience wrapper (re-runs param prep each call; prefer the class)."""
    wt_pad, b_pad = prepare_classifier_params(weight, bias, compute_dtype)
    return _forward_padded(z, wt_pad, b_pad,
                           num_classes=weight.shape[0], block_m=block_m)


if __name__ == "__main__":
    dim = 1024        # module default
    num_classes = 10  # module default
    batch = 8         # small batch

    key = jax.random.PRNGKey(0)
    kz, kw, kb = jax.random.split(key, 3)
    bound = 1.0 / jnp.sqrt(jnp.float32(dim))
    z = jax.random.normal(kz, (batch, dim), dtype=jnp.float32)
    weight = jax.random.uniform(kw, (num_classes, dim), jnp.float32, -bound, bound)
    bias = jax.random.uniform(kb, (num_classes,), jnp.float32, -bound, bound)

    model = GoogLeNetClassifier(weight, bias)   # param prep happens once, here

    out = jax.block_until_ready(model(z))
    assert out.shape == (batch, num_classes)
    assert out.dtype == jnp.float32

    # Reference 1: identical math to the kernel (bf16 inputs, f32 accumulation).
    ref_bf16 = jnp.dot(z.astype(jnp.bfloat16), weight.T.astype(jnp.bfloat16),
                       preferred_element_type=jnp.float32) + bias
    assert jnp.allclose(out, ref_bf16, atol=1e-4, rtol=1e-4), "mismatch vs bf16 reference"

    # Reference 2: original f32 module semantics (loose tol: bf16 compute is a documented choice).
    ref_f32 = z @ weight.T + bias
    assert jnp.allclose(out, ref_f32, atol=3e-2, rtol=3e-2), "mismatch vs f32 module reference"

    # Ragged / small / split-threshold batches to lock in trailing-block handling.
    for b_test in (5, 20, 260):
        z_t = jax.random.normal(jax.random.PRNGKey(b_test), (b_test, dim), dtype=jnp.float32)
        out_t = jax.block_until_ready(model(z_t))
        ref_t = z_t @ weight.T + bias
        assert out_t.shape == (b_test, num_classes)
        assert jnp.allclose(out_t, ref_t, atol=3e-2, rtol=3e-2), f"mismatch at B={b_test}"

    print("KERNEL_OK")
</pallas_src>

<mosaic_0001>
module attributes {stable_mosaic.version = 11 : i64} {
  func.func @_linear_kernel(%arg0: i32, %arg1: memref<8x1024xf32, #tpu.memory_space<vmem>>, %arg2: memref<1024x128xbf16, #tpu.memory_space<vmem>>, %arg3: memref<1x128xf32, #tpu.memory_space<vmem>>, %arg4: memref<8x128xf32, #tpu.memory_space<vmem>>) attributes {dimension_semantics = [#tpu.dimension_semantics<parallel>], iteration_bounds = array<i64: 1>, scalar_prefetch = 0 : i64, scratch_operands = 0 : i64, tpu.core_type = #tpu.core_type<tc>, window_params = [{transform_indices = @transform_0, window_bounds = array<i64: 8, 1024>}, {pipeline_mode = #tpu.pipeline_mode<synchronous>, transform_indices = @transform_1, window_bounds = array<i64: 1024, 128>}, {pipeline_mode = #tpu.pipeline_mode<synchronous>, transform_indices = @transform_2, window_bounds = array<i64: 1, 128>}, {transform_indices = @transform_3, window_bounds = array<i64: 8, 128>}]} {
    %c0 = arith.constant 0 : index
    %c0_0 = arith.constant 0 : index
    %0 = vector.load %arg1[%c0, %c0_0] : memref<8x1024xf32, #tpu.memory_space<vmem>>, vector<8x1024xf32>
    %1 = arith.truncf %0 : vector<8x1024xf32> to vector<8x1024xbf16>
    %c0_1 = arith.constant 0 : index
    %c0_2 = arith.constant 0 : index
    %2 = vector.load %arg2[%c0_1, %c0_2] : memref<1024x128xbf16, #tpu.memory_space<vmem>>, vector<1024x128xbf16>
    %cst = arith.constant dense<0.000000e+00> : vector<8x128xf32>
    %3 = tpu.matmul %1, %2, %cst {dimension_numbers = #tpu.dot_dimension_numbers<[1], [0], [0], [1], [0, 0, 1, 1], [], []>} : vector<8x1024xbf16>, vector<1024x128xbf16>, vector<8x128xf32> -> vector<8x128xf32>
    %c0_3 = arith.constant 0 : index
    %c0_4 = arith.constant 0 : index
    %4 = vector.load %arg3[%c0_3, %c0_4] : memref<1x128xf32, #tpu.memory_space<vmem>>, vector<1x128xf32>
    %5 = vector.broadcast %4 : vector<1x128xf32> to vector<8x128xf32>
    %6 = arith.addf %3, %5 : vector<8x128xf32>
    %c0_5 = arith.constant 0 : index
    %c0_6 = arith.constant 0 : index
    %7 = vector.load %arg4[%c0_5, %c0_6] : memref<8x128xf32, #tpu.memory_space<vmem>>, vector<8x128xf32>
    tpu.vector_store %arg4[%c0_5, %c0_6], %6 {strides = array<i32>} : memref<8x128xf32, #tpu.memory_space<vmem>>, vector<8x128xf32>,
    return
  }
  func.func @transform_0(%arg0: i32) -> (i32, i32) {
    %c0_i32 = arith.constant 0 : i32
    %c0_i32_0 = arith.constant 0 : i32
    return %arg0, %c0_i32 : i32, i32
  }
  func.func @transform_1(%arg0: i32) -> (i32, i32) {
    %c0_i32 = arith.constant 0 : i32
    %c0_i32_0 = arith.constant 0 : i32
    %c0_i32_1 = arith.constant 0 : i32
    return %c0_i32, %c0_i32_0 : i32, i32
  }
  func.func @transform_2(%arg0: i32) -> (i32, i32) {
    %c0_i32 = arith.constant 0 : i32
    %c0_i32_0 = arith.constant 0 : i32
    %c0_i32_1 = arith.constant 0 : i32
    return %c0_i32, %c0_i32_0 : i32, i32
  }
  func.func @transform_3(%arg0: i32) -> (i32, i32) {
    %c0_i32 = arith.constant 0 : i32
    %c0_i32_0 = arith.constant 0 : i32
    return %arg0, %c0_i32 : i32, i32
  }
}

</mosaic_0001>

<bundles_post_ra>
// kernel: _forward_padded.1
= control target key start
LH: loop header
LB: loop body
LE: loop exit
PB: predicated region body
PF: predicated region fallthrough
CT: control target
= control target key end

     0   :  { %8 = vsyncpa [#allocation3], 0  ;;  %s1119_s0 = inlined_call_operand.hbm [shape: f32[8,1024], index: 0, kind: input, shape index: {}]   ;;  %s1120_s1 = inlined_call_operand.hbm [shape: bf16[1024,128], index: 1, kind: input, shape index: {}]   ;;  %s1121_s2 = inlined_call_operand.vmem [shape: f32[1,128], index: 2, kind: input, shape index: {}]   ;;  %s1122_s3 = inlined_call_operand.hbm [shape: f32[8,128], index: 3, kind: output, shape index: {}]  }
   0x1   :  { %9 = vsyncpa [#allocation6], 0 }
   0x2   :  { %10 = vsyncpa [#allocation4], 0  ;;  %s1048_s12 = smov [#allocation2]   ;;  %s1049_s14 = smov [#allocation5]  }
   0x3   :  { %s17_s13 = sshll.u32 %s1048_s12, 4  ;;  %s26_s15 = sshll.u32 %s1049_s14, 4  ;;  %s18_s13 = int_to_ptr.vmem [resolvable:$true] %s17_s13  ;;  %s1073_s15 = int_to_ptr.vmem [resolvable:$true] %s26_s15 }
   0x4   :  { %s976_s18 = scalar_lea.hbm %s1119_s0, 1024 }
   0x5   :  { %p977_p0 = scmp.ne.s32.totalorder %s1119_s0, %s976_s18  ;;  %p980_p1 = scmp.lt.u32.totalorder %s976_s18, %s1119_s0 }
   0x7   :  { %p982_p2 = pnand %p980_p1, %p977_p0 }
   0x9   :  { %985 = shalt.err (!%p982_p2)
}
   0xa   :  { %s986_s23 = scalar_lea.vmem %s18_s13, 1024  ;;  %p991_p4 = scmp.lt.s32.totalorder %s18_s13, %s18_s13 }
   0xb   :  { %p987_p3 = scmp.ne.s32.totalorder %s18_s13, %s986_s23  ;;  %p992_p5 = scmp.lt.s32.totalorder %s986_s23, %s986_s23 }
   0xd   :  { %p993_p6 = por %p992_p5, %p991_p4 }
   0xf   :  { %p994_p7 = pnand %p993_p6, %p987_p3 }
  0x11   :  { %997 = shalt.err (!%p994_p7)
}
  0x12   :  { %20 = dma.hbm_to_vmem [thread:$0]  %s1119_s0, 1024, %s18_s13, [#allocation3]  }
  0x13   :  { %s998_s28 = scalar_lea.hbm %s1120_s1, 8192 }
  0x14   :  { %p999_p8 = scmp.ne.s32.totalorder %s1120_s1, %s998_s28  ;;  %p1002_p9 = scmp.lt.u32.totalorder %s998_s28, %s1120_s1 }
  0x16   :  { %p1004_p10 = pnand %p1002_p9, %p999_p8 }
  0x18   :  { %1007 = shalt.err (!%p1004_p10)
}
  0x19   :  { %s1008_s6 = scalar_lea.vmem %s1073_s15, 8192  ;;  %p1013_p12 = scmp.lt.s32.totalorder %s1073_s15, %s1073_s15 }
  0x1a   :  { %p1009_p11 = scmp.ne.s32.totalorder %s1073_s15, %s1008_s6  ;;  %p1014_p13 = scmp.lt.s32.totalorder %s1008_s6, %s1008_s6 }
  0x1c   :  { %p1015_p0 = por %p1014_p13, %p1013_p12 }
  0x1e   :  { %p1016_p1 = pnand %p1015_p0, %p1009_p11 }
  0x20   :  { %1019 = shalt.err (!%p1016_p1)
}
  0x21   :  { %s1050_s0 = smov 64   ;;  %s1051_s7 = smov 4  }
  0x22   :  { %32 = dma.hbm_to_vmem [thread:$0]  %s1120_s1, 8192, %s1073_s15, [#allocation6], %s1050_s0, %s1050_s0, %s1051_s7  }
  0x23   :  { %1042 = dma.done.wait [#allocation3], 1024  }
  0x24   :  { %1043 = vsyncadd [#allocation3], 4294966272 }
  0x25   :  { %1044 = dma.done.wait [#allocation6], 8192  }
  0x26   :  { %1045 = vsyncadd [#allocation6], 4294959104  ;;  %v912_v0 = vld [vmem:[#allocation5 + $0x40] sm:$0xff]   ;;  %v916_v4 = vld [vmem:[#allocation5 + $0x48] sm:$0xff]  }
  0x27   :  { %v913_v1 = vld [vmem:[#allocation5 + $0xc0] sm:$0xff]   ;;  %819 = vmatprep.subr.bf16.mxu0 %v912_v0  ;;  %v917_v5 = vld [vmem:[#allocation5 + $0xc8] sm:$0xff]   ;;  %v920_v8 = vld [vmem:[#allocation5 + $0x50] sm:$0xff]  }
  0x28   :  { %v914_v2 = vld [vmem:[#allocation5] sm:$0xff]   ;;  %841 = vmatprep.subr.bf16.mxu1 %v913_v1  ;;  %v918_v6 = vld [vmem:[#allocation5 + $0x8] sm:$0xff]   ;;  %v921_v9 = vld [vmem:[#allocation5 + $0xd0] sm:$0xff]  }
  0x29   :  { %v915_v3 = vld [vmem:[#allocation5 + $0x80] sm:$0xff]   ;;  %820 = vmatpush3.bf16.msra.mxu0 %v914_v2  ;;  %v919_v7 = vld [vmem:[#allocation5 + $0x88] sm:$0xff]   ;;  %v922_v10 = vld [vmem:[#allocation5 + $0x10] sm:$0xff]  }
  0x2a   :  { %842 = vmatpush3.bf16.msra.mxu1 %v915_v3  ;;  %821 = vmatprep.subr.bf16.mxu0 %v916_v4  ;;  %v923_v11 = vld [vmem:[#allocation5 + $0x90] sm:$0xff]   ;;  %v924_v12 = vld [vmem:[#allocation5 + $0x58] sm:$0xff]   ;;  %v928_v16 = vld [vmem:[#allocation5 + $0x60] sm:$0xff]  }
  0x2b   :  { %843 = vmatprep.subr.bf16.mxu1 %v917_v5  ;;  %v925_v13 = vld [vmem:[#allocation5 + $0xd8] sm:$0xff]   ;;  %v929_v17 = vld [vmem:[#allocation5 + $0xe0] sm:$0xff]   ;;  %v932_v20 = vld [vmem:[#allocation5 + $0x68] sm:$0xff]  }
  0x2c   :  { %v926_v14 = vld [vmem:[#allocation5 + $0x18] sm:$0xff]   ;;  %v930_v18 = vld [vmem:[#allocation5 + $0x20] sm:$0xff]   ;;  %v933_v21 = vld [vmem:[#allocation5 + $0xe8] sm:$0xff]  }
  0x2d   :  { %822 = vmatpush3.bf16.msra.mxu0 %v918_v6  ;;  %v927_v15 = vld [vmem:[#allocation5 + $0x98] sm:$0xff]   ;;  %v931_v19 = vld [vmem:[#allocation5 + $0xa0] sm:$0xff]   ;;  %v934_v22 = vld [vmem:[#allocation5 + $0x28] sm:$0xff]  }
  0x2e   :  { %844 = vmatpush3.bf16.msra.mxu1 %v919_v7  ;;  %823 = vmatprep.subr.bf16.mxu0 %v920_v8  ;;  %v935_v23 = vld [vmem:[#allocation5 + $0xa8] sm:$0xff]   ;;  %v936_v24 = vld [vmem:[#allocation5 + $0x70] sm:$0xff]   ;;  %v940_v28 = vld [vmem:[#allocation5 + $0x78] sm:$0xff]  }
  0x2f   :  { %845 = vmatprep.subr.bf16.mxu1 %v921_v9  ;;  %v937_v25 = vld [vmem:[#allocation5 + $0xf0] sm:$0xff]   ;;  %v941_v29 = vld [vmem:[#allocation5 + $0xf8] sm:$0xff]   ;;  %v43_v32 = vld [vmem:[#allocation2 + $0x8] sm:$0xff] }
  0x30   :  { %v938_v26 = vld [vmem:[#allocation5 + $0x30] sm:$0xff]   ;;  %v942_v30 = vld [vmem:[#allocation5 + $0x38] sm:$0xff]   ;;  %v42_v34 = vld [vmem:[#allocation2] sm:$0xff]  ;;  %v51_v35 = vpack.c.bf16 %v43_v32, %v43_v32 }
  0x31   :  { %824 = vmatpush3.bf16.msra.mxu0 %v922_v10  ;;  %v939_v27 = vld [vmem:[#allocation5 + $0xb0] sm:$0xff]   ;;  %v943_v31 = vld [vmem:[#allocation5 + $0xb8] sm:$0xff]   ;;  %v50_v37 = vpack.c.bf16 %v42_v34, %v42_v34  ;;  %v944_v40 = vld [vmem:[#allocation5 + $0x140] sm:$0xff]  }
  0x32   :  { %846 = vmatpush3.bf16.msra.mxu1 %v923_v11  ;;  %825 = vmatprep.subr.bf16.mxu0 %v924_v12  ;;  %v45_v33 = vld [vmem:[#allocation2 + $0x18] sm:$0xff]  ;;  %v44_v38 = vld [vmem:[#allocation2 + $0x10] sm:$0xff]  ;;  %v945_v41 = vld [vmem:[#allocation5 + $0x1c0] sm:$0xff]  }
  0x33   :  { %847 = vmatprep.subr.bf16.mxu1 %v925_v13  ;;  %v53_v36 = vpack.c.bf16 %v45_v33, %v45_v33  ;;  %v52_v39 = vpack.c.bf16 %v44_v38, %v44_v38  ;;  %609 = vmatprep.mubr.bf16.mxu0 %v51_v35  ;;  %v946_v42 = vld [vmem:[#allocation5 + $0x100] sm:$0xff]   ;;  %v948_v44 = vld [vmem:[#allocation5 + $0x148] sm:$0xff]   ;;  %v952_v48 = vld [vmem:[#allocation5 + $0x150] sm:$0xff]  }
  0x34   :  { %v947_v43 = vld [vmem:[#allocation5 + $0x180] sm:$0xff]   ;;  %v949_v45 = vld [vmem:[#allocation5 + $0x1c8] sm:$0xff]   ;;  %v953_v49 = vld [vmem:[#allocation5 + $0x1d0] sm:$0xff]  }
  0x35   :  { %826 = vmatpush3.bf16.msra.mxu0 %v926_v14  ;;  %649 = vmatprep.mubr.bf16.mxu1 %v53_v36  ;;  %v950_v46 = vld [vmem:[#allocation5 + $0x108] sm:$0xff]   ;;  %v954_v50 = vld [vmem:[#allocation5 + $0x110] sm:$0xff]   ;;  %v956_v52 = vld [vmem:[#allocation5 + $0x158] sm:$0xff]  }
  0x36   :  { %848 = vmatpush3.bf16.msra.mxu1 %v927_v15  ;;  %827 = vmatprep.subr.bf16.mxu0 %v928_v16  ;;  %v951_v47 = vld [vmem:[#allocation5 + $0x188] sm:$0xff]   ;;  %v955_v51 = vld [vmem:[#allocation5 + $0x190] sm:$0xff]   ;;  %v957_v53 = vld [vmem:[#allocation5 + $0x1d8] sm:$0xff]  }
  0x37   :  { %849 = vmatprep.subr.bf16.mxu1 %v929_v17  ;;  %v958_v54 = vld [vmem:[#allocation5 + $0x118] sm:$0xff]   ;;  %v960_v56 = vld [vmem:[#allocation5 + $0x160] sm:$0xff]   ;;  %v964_v60 = vld [vmem:[#allocation5 + $0x168] sm:$0xff]  }
  0x38   :  { %v959_v55 = vld [vmem:[#allocation5 + $0x198] sm:$0xff]   ;;  %v961_v57 = vld [vmem:[#allocation5 + $0x1e0] sm:$0xff]   ;;  %v965_v61 = vld [vmem:[#allocation5 + $0x1e8] sm:$0xff]  }
  0x39   :  { %828 = vmatpush3.bf16.msra.mxu0 %v930_v18  ;;  %v962_v58 = vld [vmem:[#allocation5 + $0x120] sm:$0xff]   ;;  %v966_v62 = vld [vmem:[#allocation5 + $0x128] sm:$0xff]   ;;  %v968_v0 = vld [vmem:[#allocation5 + $0x170] sm:$0xff]  }
  0x3a   :  { %850 = vmatpush3.bf16.msra.mxu1 %v931_v19  ;;  %829 = vmatprep.subr.bf16.mxu0 %v932_v20  ;;  %v963_v59 = vld [vmem:[#allocation5 + $0x1a0] sm:$0xff]   ;;  %v967_v63 = vld [vmem:[#allocation5 + $0x1a8] sm:$0xff]   ;;  %v969_v1 = vld [vmem:[#allocation5 + $0x1f0] sm:$0xff]  }
  0x3b   :  { %851 = vmatprep.subr.bf16.mxu1 %v933_v21  ;;  %v970_v2 = vld [vmem:[#allocation5 + $0x130] sm:$0xff]   ;;  %v972_v4 = vld [vmem:[#allocation5 + $0x178] sm:$0xff]   ;;  %v47_v8 = vld [vmem:[#allocation2 + $0x28] sm:$0xff] }
  0x3c   :  { %v971_v3 = vld [vmem:[#allocation5 + $0x1b0] sm:$0xff]   ;;  %v973_v5 = vld [vmem:[#allocation5 + $0x1f8] sm:$0xff]   ;;  %v55_v10 = vpack.c.bf16 %v47_v8, %v47_v8  ;;  %v46_v12 = vld [vmem:[#allocation2 + $0x20] sm:$0xff] }
  0x3d   :  { %830 = vmatpush3.bf16.msra.mxu0 %v934_v22  ;;  %v974_v6 = vld [vmem:[#allocation5 + $0x138] sm:$0xff]   ;;  %v48_v13 = vld [vmem:[#allocation2 + $0x30] sm:$0xff]  ;;  %v54_v14 = vpack.c.bf16 %v46_v12, %v46_v12  ;;  %v754_v18 = vld [vmem:[%s1121_s2] ss:$0 sm:$0xff]  ;;  %s1052_s2 = smov [#allocation7]  }
  0x3e   :  { %852 = vmatpush3.bf16.msra.mxu1 %v935_v23  ;;  %831 = vmatprep.subr.bf16.mxu0 %v936_v24  ;;  %v975_v7 = vld [vmem:[#allocation5 + $0x1b8] sm:$0xff]   ;;  %v56_v15 = vpack.c.bf16 %v48_v13, %v48_v13  ;;  %s744_s11 = sshll.u32 %s1052_s2, 4  ;;  %s745_s11 = int_to_ptr.vmem [resolvable:$true] %s744_s11 }
  0x3f   :  { %853 = vmatprep.subr.bf16.mxu1 %v937_v25  ;;  %v49_v9 = vld [vmem:[#allocation2 + $0x38] sm:$0xff]  ;;  %s1020_s12 = scalar_lea.vmem %s745_s11, 128  ;;  %p1025_p3 = scmp.lt.s32.totalorder %s745_s11, %s745_s11 }
  0x40   :  { %v57_v11 = vpack.c.bf16 %v49_v9, %v49_v9  ;;  %p1021_p2 = scmp.ne.s32.totalorder %s745_s11, %s1020_s12  ;;  %p1026_p4 = scmp.lt.s32.totalorder %s1020_s12, %s1020_s12 }
  0x41   :  { %832 = vmatpush3.bf16.msra.mxu0 %v938_v26 }
  0x42   :  { %854 = vmatpush3.bf16.msra.mxu1 %v939_v27  ;;  %833 = vmatprep.subr.bf16.mxu0 %v940_v28  ;;  %p1027_p5 = por %p1026_p4, %p1025_p3 }
  0x43   :  { %855 = vmatprep.subr.bf16.mxu1 %v941_v29 }
  0x44   :  { %p1028_p6 = pnand %p1027_p5, %p1021_p2 }
  0x45   :  { %834 = vmatpush3.bf16.msra.mxu0 %v942_v30 }
  0x46   :  { %856 = vmatpush3.bf16.msra.mxu1 %v943_v31  ;;  %863 = vmatprep.subr.bf16.mxu0 %v944_v40 }
  0x47   :  { %885 = vmatprep.subr.bf16.mxu1 %v945_v41 }
  0x48   :  { %610 = vmatmul.mubr.bf16.vlgmr.msra.gmra.mrb[0].mxu0 %v50_v37 }
  0x49   :  { %650 = vmatmul.mubr.bf16.vlgmr.msra.gmra.mrb[0].mxu1 %v52_v39  ;;  %864 = vmatpush3.bf16.msra.mxu0 %v946_v42 }
  0x4a   :  { %886 = vmatpush3.bf16.msra.mxu1 %v947_v43  ;;  %865 = vmatprep.subr.bf16.mxu0 %v948_v44 }
  0x4b   :  { %887 = vmatprep.subr.bf16.mxu1 %v949_v45  ;;  %689 = vmatprep.mubr.bf16.mxu0 %v55_v10 }
  0x4c   :  { %729 = vmatprep.mubr.bf16.mxu1 %v57_v11 }
  0x4d   :  { %866 = vmatpush3.bf16.msra.mxu0 %v950_v46 }
  0x4e   :  { %888 = vmatpush3.bf16.msra.mxu1 %v951_v47  ;;  %867 = vmatprep.subr.bf16.mxu0 %v952_v48 }
  0x4f   :  { %889 = vmatprep.subr.bf16.mxu1 %v953_v49 }
  0x51   :  { %868 = vmatpush3.bf16.msra.mxu0 %v954_v50 }
  0x52   :  { %890 = vmatpush3.bf16.msra.mxu1 %v955_v51  ;;  %869 = vmatprep.subr.bf16.mxu0 %v956_v52 }
  0x53   :  { %891 = vmatprep.subr.bf16.mxu1 %v957_v53 }
  0x55   :  { %870 = vmatpush3.bf16.msra.mxu0 %v958_v54 }
  0x56   :  { %892 = vmatpush3.bf16.msra.mxu1 %v959_v55  ;;  %871 = vmatprep.subr.bf16.mxu0 %v960_v56 }
  0x57   :  { %893 = vmatprep.subr.bf16.mxu1 %v961_v57 }
  0x59   :  { %872 = vmatpush3.bf16.msra.mxu0 %v962_v58 }
  0x5a   :  { %894 = vmatpush3.bf16.msra.mxu1 %v963_v59  ;;  %873 = vmatprep.subr.bf16.mxu0 %v964_v60 }
  0x5b   :  { %895 = vmatprep.subr.bf16.mxu1 %v965_v61 }
  0x5d   :  { %874 = vmatpush3.bf16.msra.mxu0 %v966_v62 }
  0x5e   :  { %896 = vmatpush3.bf16.msra.mxu1 %v967_v63  ;;  %875 = vmatprep.subr.bf16.mxu0 %v968_v0 }
  0x5f   :  { %897 = vmatprep.subr.bf16.mxu1 %v969_v1 }
  0x61   :  { %876 = vmatpush3.bf16.msra.mxu0 %v970_v2 }
  0x62   :  { %898 = vmatpush3.bf16.msra.mxu1 %v971_v3  ;;  %877 = vmatprep.subr.bf16.mxu0 %v972_v4 }
  0x63   :  { %899 = vmatprep.subr.bf16.mxu1 %v973_v5 }
  0x65   :  { %878 = vmatpush3.bf16.msra.mxu0 %v974_v6 }
  0x66   :  { %900 = vmatpush3.bf16.msra.mxu1 %v975_v7 }
  0x68   :  { %690 = vmatmul.mubr.bf16.vlgmr.msra.gmra.mrb[4].mxu0 %v54_v14 }
  0x69   :  { %730 = vmatmul.mubr.bf16.vlgmr.msra.gmra.mrb[4].mxu1 %v56_v15 }
 0x11b   :  { %v835_v16 = vpop.f32.mrb[0].mxu0 }
 0x11c   :  { %v857_v17 = vpop.f32.mrb[0].mxu1  ;;  %v836_v19 = vpop.f32.mrb[1].mxu0 }
 0x11d   :  { %v858_v20 = vpop.f32.mrb[1].mxu1  ;;  %v837_v21 = vadd.f32 %v836_v19, %v835_v16  ;;  %v838_v23 = vpop.f32.mrb[2].mxu0 }
 0x11e   :  { %v859_v22 = vadd.f32 %v858_v20, %v857_v17  ;;  %v860_v24 = vpop.f32.mrb[2].mxu1  ;;  %v839_v25 = vpop.f32.mrb[3].mxu0 }
 0x11f   :  { %v861_v26 = vpop.f32.mrb[3].mxu1  ;;  %v612_v27 = vadd.f32 %v837_v21, %v754_v18 }
 0x121   :  { %v652_v28 = vadd.f32 %v859_v22, %v612_v27 }
 0x13b   :  { %v879_v29 = vpop.f32.mrb[4].mxu0 }
 0x13c   :  { %v901_v30 = vpop.f32.mrb[4].mxu1  ;;  %v880_v31 = vpop.f32.mrb[5].mxu0 }
 0x13d   :  { %v881_v32 = vadd.f32 %v880_v31, %v879_v29  ;;  %v902_v33 = vpop.f32.mrb[5].mxu1  ;;  %v882_v34 = vpop.f32.mrb[6].mxu0 }
 0x13e   :  { %v903_v35 = vadd.f32 %v902_v33, %v901_v30  ;;  %v904_v36 = vpop.f32.mrb[6].mxu1  ;;  %v883_v37 = vpop.f32.mrb[7].mxu0 }
 0x13f   :  { %v692_v38 = vadd.f32 %v881_v32, %v652_v28  ;;  %v905_v39 = vpop.f32.mrb[7].mxu1 }
 0x141   :  { %v732_v40 = vadd.f32 %v903_v35, %v692_v38 }
 0x143   :  { %737 = vst [vmem:[#allocation7] sm:$0xff] %v732_v40 }
 0x144   :  { %1031 = shalt.err (!%p1028_p6)
}
 0x145   :  { %s1032_s15 = scalar_lea.hbm %s1122_s3, 128 }
 0x146   :  { %p1033_p7 = scmp.ne.s32.totalorder %s1122_s3, %s1032_s15  ;;  %p1036_p8 = scmp.lt.u32.totalorder %s1032_s15, %s1122_s3 }
 0x148   :  { %p1038_p9 = pnand %p1036_p8, %p1033_p7 }
 0x14a   :  { %1041 = shalt.err (!%p1038_p9)
}
 0x14b   :  { %747 = dma.vmem_to_hbm [thread:$0]  %s745_s11, 128, %s1122_s3, [#allocation4]  }
 0x14c   :  { %1046 = dma.done.wait [#allocation4], 128  }
 0x14d   :  { %1047 = vsyncadd [#allocation4], 4294967168 }
 0x14e   :  { %751 = vsyncpa [#allocation3], 1 }
 0x14f   :  { %752 = vsyncpa [#allocation6], 1 }
 0x150   :  { %753 = vsyncpa [#allocation4], 1 }

</bundles_post_ra>
